<compile_context>
chip_gen: v7x
topology: tpu7x:2x2x1
jax: 0.10.0
libtpu: 0.0.40
codegen_flags: <defaults>
</compile_context>

<pallas_src>
import functools

import jax
import jax.numpy as jnp
from jax.experimental import pallas as pl
from jax.experimental.pallas import tpu as pltpu


# -----------------------------------------------------------------------------
# Config (mirrors the PyTorch `config` object)
# -----------------------------------------------------------------------------
class Config:
    VIT_FEATURE_DIM = 64
    HIDDEN_DIM = 32
    OT_EPSILON = 0.1
    OT_MAX_ITER = 10
    OT_THRESHOLD = 1e-3


def _round_up(x, m):
    return ((x + m - 1) // m) * m


# -----------------------------------------------------------------------------
# Pallas kernel
# -----------------------------------------------------------------------------
def _ot_align_kernel(img_ref, eds_ref, xrd_ref,
                     wi_ref, we_ref, wx_ref, b_ref,
                     out_ref):
    f32 = jnp.float32
    # Three MXU pushes accumulating into a single (tb, 3H) f32 slab.  The
    # weights are column-extended (zeros outside each modality's H columns),
    # so the result lands directly in its final lane layout: columns [0:H]
    # are img_f, [H:2H] are eds_f (== P*eds_f, P == 1 exactly), [2H:3H] xrd_f.
    acc = jnp.dot(img_ref[...], wi_ref[...], preferred_element_type=f32)
    acc = acc + jnp.dot(eds_ref[...], we_ref[...], preferred_element_type=f32)
    acc = acc + jnp.dot(xrd_ref[...], wx_ref[...], preferred_element_type=f32)
    # Single bias add + single store (no masked 32-lane sub-stores).
    out_ref[...] = acc + b_ref[...]


# -----------------------------------------------------------------------------
# Wrapper
# -----------------------------------------------------------------------------
def ot_alignment_forward(params, image_features, eds_features, xrd_features, cfg,
                         *, block_b=2048):
    B = image_features.shape[0]
    H = cfg.HIDDEN_DIM
    Dv = image_features.shape[1]
    Dh = eds_features.shape[1]
    f32 = jnp.float32

    # Column-extended weights / fused bias, built once per call (tiny, ~10 KiB;
    # can be hoisted to param-init time).  Zero columns contribute exact zeros,
    # so the fused matmul is bitwise equivalent to three separate projections.
    W_img_ext = jnp.zeros((Dv, 3 * H), f32).at[:, 0 * H:1 * H].set(params["W_img"])
    W_eds_ext = jnp.zeros((Dh, 3 * H), f32).at[:, 1 * H:2 * H].set(params["W_eds"])
    W_xrd_ext = jnp.zeros((Dh, 3 * H), f32).at[:, 2 * H:3 * H].set(params["W_xrd"])
    b_ext = jnp.concatenate(
        [params["b_img"], params["b_eds"], params["b_xrd"]], axis=1)      # (1, 3H)

    # Batch tile: sublane-aligned and large (amortizes per-step overhead,
    # approaches the HBM roofline), but capped so the grid keeps >= 2 steps
    # whenever B allows it -- on v7x the "parallel" batch axis is what shards
    # work across the two TensorCores, and a 1-step grid would idle one core.
    # At tb=2048 the double-buffered, 128-lane-padded VMEM footprint is ~8 MiB
    # (fits the v5e 16 MiB scoped default; set vmem_limit_bytes if block_b>=4096).
    tb = min(block_b, max(8, _round_up(_round_up(B, 8) // 2, 8)))
    b_pad = _round_up(B, tb)
    if b_pad != B:
        pad = ((0, b_pad - B), (0, 0))
        image_features = jnp.pad(image_features, pad)
        eds_features = jnp.pad(eds_features, pad)
        xrd_features = jnp.pad(xrd_features, pad)

    grid = (b_pad // tb,)

    def batch_spec(d):
        return pl.BlockSpec((tb, d), lambda i: (i, 0))

    def resident_spec(arr):
        # Constant index_map -> block never changes, so weights/bias stay
        # VMEM-resident across grid steps (no per-step re-DMA).
        return pl.BlockSpec(arr.shape, lambda i: (0, 0))

    out = pl.pallas_call(
        _ot_align_kernel,
        out_shape=jax.ShapeDtypeStruct((b_pad, 3 * H), f32),
        grid_spec=pltpu.PrefetchScalarGridSpec(
            num_scalar_prefetch=0,
            grid=grid,
            in_specs=[
                batch_spec(Dv), batch_spec(Dh), batch_spec(Dh),
                resident_spec(W_img_ext), resident_spec(W_eds_ext),
                resident_spec(W_xrd_ext), resident_spec(b_ext),
            ],
            out_specs=pl.BlockSpec((tb, 3 * H), lambda i: (i, 0)),
        ),
        compiler_params=pltpu.CompilerParams(
            dimension_semantics=("parallel",),
        ),
    )(image_features, eds_features, xrd_features,
      W_img_ext, W_eds_ext, W_xrd_ext, b_ext)

    # Padded rows are bias-only garbage; keep this slice.
    return out[:B] if b_pad != B else out


# -----------------------------------------------------------------------------
# Pure-JAX reference (faithful: cost_net + iterative Sinkhorn with freeze;
# verifies that eliding the constant-P path does not change the output)
# -----------------------------------------------------------------------------
def ot_alignment_reference(params, img, eds, xrd, cfg):
    eps, max_iter, thr = cfg.OT_EPSILON, cfg.OT_MAX_ITER, cfg.OT_THRESHOLD
    img_f = img @ params["W_img"] + params["b_img"]
    eds_f = eds @ params["W_eds"] + params["b_eds"]
    xrd_f = xrd @ params["W_xrd"] + params["b_xrd"]

    def cost(x2):
        # concat([img_f, x2]) @ W1 == img_f @ W1[:H] + x2 @ W1[H:]
        h = img_f @ params["W1a"] + x2 @ params["W1b"] + params["b1"]
        h = jnp.maximum(h, 0.0)
        return h @ params["W2"] + params["b2"]          # (B, 1) per-sample 1x1 cost

    def sinkhorn(c):                                     # batched 1x1 problems
        neg_c = -c / eps
        lm = jnp.log(jnp.float32(1.0) + jnp.float32(1e-8))
        u = jnp.zeros_like(c)
        v = jnp.zeros_like(c)
        done = jnp.zeros(c.shape, dtype=bool)
        for _ in range(max_iter):
            u_new = lm - (neg_c + v)
            v_new = lm - (neg_c + u_new)
            conv = jnp.abs(u_new - u) < thr
            u = jnp.where(done, u, u_new)
            v = jnp.where(done, v, v_new)
            done = done | conv
        return jnp.exp(neg_c + u + v)

    P_e = sinkhorn(cost(eds_f))
    P_x = sinkhorn(cost(xrd_f))
    return jnp.concatenate([img_f, P_e * eds_f, P_x * xrd_f], axis=1)


# -----------------------------------------------------------------------------
# Deterministic parameter init (PyTorch nn.Linear style: U(-1/sqrt(fan_in), ..))
# -----------------------------------------------------------------------------
def init_params(key, cfg):
    H, Dv = cfg.HIDDEN_DIM, cfg.VIT_FEATURE_DIM
    Dh2 = H // 2
    ks = jax.random.split(key, 10)

    def lin(k, fan_in, fan_out):
        bound = 1.0 / jnp.sqrt(jnp.float32(fan_in))
        kw, kb = jax.random.split(k)
        W = jax.random.uniform(kw, (fan_in, fan_out), jnp.float32, -bound, bound)
        b = jax.random.uniform(kb, (1, fan_out), jnp.float32, -bound, bound)
        return W, b

    W_img, b_img = lin(ks[0], Dv, H)
    W_eds, b_eds = lin(ks[1], Dh2, H)
    W_xrd, b_xrd = lin(ks[2], Dh2, H)
    W1, b1 = lin(ks[3], 2 * H, H)           # cost_net layer 0 (reference only)
    W2, b2 = lin(ks[4], H, 1)               # cost_net layer 2 (reference only)

    return {
        "W_img": W_img, "b_img": b_img,
        "W_eds": W_eds, "b_eds": b_eds,
        "W_xrd": W_xrd, "b_xrd": b_xrd,
        # cost_net params: only used by the reference; the kernel elides the
        # cost path because the 1x1 Sinkhorn transport is exactly 1.0 in f32.
        "W1a": W1[:H, :], "W1b": W1[H:, :], "b1": b1,
        "W2": W2, "b2": b2,
    }


# -----------------------------------------------------------------------------
# Main
# -----------------------------------------------------------------------------
if __name__ == "__main__":
    cfg = Config()
    B = 8

    key = jax.random.PRNGKey(0)
    k_params, k_img, k_eds, k_xrd = jax.random.split(key, 4)
    params = init_params(k_params, cfg)

    image_features = jax.random.normal(k_img, (B, cfg.VIT_FEATURE_DIM), jnp.float32)
    eds_features = jax.random.normal(k_eds, (B, cfg.HIDDEN_DIM // 2), jnp.float32)
    xrd_features = jax.random.normal(k_xrd, (B, cfg.HIDDEN_DIM // 2), jnp.float32)

    out = ot_alignment_forward(params, image_features, eds_features, xrd_features, cfg)
    out = jax.block_until_ready(out)

    ref = ot_alignment_reference(params, image_features, eds_features, xrd_features, cfg)
    assert out.shape == (B, 3 * cfg.HIDDEN_DIM)
    assert jnp.allclose(out, ref, atol=1e-4, rtol=1e-4), "mismatch vs reference"

    print("KERNEL_OK")
</pallas_src>

<mosaic_0001>
module attributes {stable_mosaic.version = 11 : i64} {
  func.func @_ot_align_kernel(%arg0: i32, %arg1: memref<8x64xf32, #tpu.memory_space<vmem>>, %arg2: memref<8x16xf32, #tpu.memory_space<vmem>>, %arg3: memref<8x16xf32, #tpu.memory_space<vmem>>, %arg4: memref<64x96xf32, #tpu.memory_space<vmem>>, %arg5: memref<16x96xf32, #tpu.memory_space<vmem>>, %arg6: memref<16x96xf32, #tpu.memory_space<vmem>>, %arg7: memref<1x96xf32, #tpu.memory_space<vmem>>, %arg8: memref<8x96xf32, #tpu.memory_space<vmem>>) attributes {dimension_semantics = [#tpu.dimension_semantics<parallel>], iteration_bounds = array<i64: 1>, scalar_prefetch = 0 : i64, scratch_operands = 0 : i64, tpu.core_type = #tpu.core_type<tc>, window_params = [{transform_indices = @transform_0, window_bounds = array<i64: 8, 64>}, {transform_indices = @transform_1, window_bounds = array<i64: 8, 16>}, {transform_indices = @transform_2, window_bounds = array<i64: 8, 16>}, {pipeline_mode = #tpu.pipeline_mode<synchronous>, transform_indices = @transform_3, window_bounds = array<i64: 64, 96>}, {pipeline_mode = #tpu.pipeline_mode<synchronous>, transform_indices = @transform_4, window_bounds = array<i64: 16, 96>}, {pipeline_mode = #tpu.pipeline_mode<synchronous>, transform_indices = @transform_5, window_bounds = array<i64: 16, 96>}, {pipeline_mode = #tpu.pipeline_mode<synchronous>, transform_indices = @transform_6, window_bounds = array<i64: 1, 96>}, {transform_indices = @transform_7, window_bounds = array<i64: 8, 96>}]} {
    %c0 = arith.constant 0 : index
    %c0_0 = arith.constant 0 : index
    %0 = vector.load %arg1[%c0, %c0_0] : memref<8x64xf32, #tpu.memory_space<vmem>>, vector<8x64xf32>
    %c0_1 = arith.constant 0 : index
    %c0_2 = arith.constant 0 : index
    %1 = vector.load %arg4[%c0_1, %c0_2] : memref<64x96xf32, #tpu.memory_space<vmem>>, vector<64x96xf32>
    %cst = arith.constant dense<0.000000e+00> : vector<8x96xf32>
    %2 = tpu.matmul %0, %1, %cst {dimension_numbers = #tpu.dot_dimension_numbers<[1], [0], [0], [1], [0, 0, 1, 1], [], []>} : vector<8x64xf32>, vector<64x96xf32>, vector<8x96xf32> -> vector<8x96xf32>
    %c0_3 = arith.constant 0 : index
    %c0_4 = arith.constant 0 : index
    %3 = vector.load %arg2[%c0_3, %c0_4] : memref<8x16xf32, #tpu.memory_space<vmem>>, vector<8x16xf32>
    %c0_5 = arith.constant 0 : index
    %c0_6 = arith.constant 0 : index
    %4 = vector.load %arg5[%c0_5, %c0_6] : memref<16x96xf32, #tpu.memory_space<vmem>>, vector<16x96xf32>
    %cst_7 = arith.constant dense<0.000000e+00> : vector<8x96xf32>
    %5 = tpu.matmul %3, %4, %cst_7 {dimension_numbers = #tpu.dot_dimension_numbers<[1], [0], [0], [1], [0, 0, 1, 1], [], []>} : vector<8x16xf32>, vector<16x96xf32>, vector<8x96xf32> -> vector<8x96xf32>
    %6 = arith.addf %2, %5 : vector<8x96xf32>
    %c0_8 = arith.constant 0 : index
    %c0_9 = arith.constant 0 : index
    %7 = vector.load %arg3[%c0_8, %c0_9] : memref<8x16xf32, #tpu.memory_space<vmem>>, vector<8x16xf32>
    %c0_10 = arith.constant 0 : index
    %c0_11 = arith.constant 0 : index
    %8 = vector.load %arg6[%c0_10, %c0_11] : memref<16x96xf32, #tpu.memory_space<vmem>>, vector<16x96xf32>
    %cst_12 = arith.constant dense<0.000000e+00> : vector<8x96xf32>
    %9 = tpu.matmul %7, %8, %cst_12 {dimension_numbers = #tpu.dot_dimension_numbers<[1], [0], [0], [1], [0, 0, 1, 1], [], []>} : vector<8x16xf32>, vector<16x96xf32>, vector<8x96xf32> -> vector<8x96xf32>
    %10 = arith.addf %6, %9 : vector<8x96xf32>
    %c0_13 = arith.constant 0 : index
    %c0_14 = arith.constant 0 : index
    %11 = vector.load %arg7[%c0_13, %c0_14] : memref<1x96xf32, #tpu.memory_space<vmem>>, vector<1x96xf32>
    %12 = vector.broadcast %11 : vector<1x96xf32> to vector<8x96xf32>
    %13 = arith.addf %10, %12 : vector<8x96xf32>
    %c0_15 = arith.constant 0 : index
    %c0_16 = arith.constant 0 : index
    %14 = vector.load %arg8[%c0_15, %c0_16] : memref<8x96xf32, #tpu.memory_space<vmem>>, vector<8x96xf32>
    tpu.vector_store %arg8[%c0_15, %c0_16], %13 {strides = array<i32>} : memref<8x96xf32, #tpu.memory_space<vmem>>, vector<8x96xf32>,
    return
  }
  func.func @transform_0(%arg0: i32) -> (i32, i32) {
    %c0_i32 = arith.constant 0 : i32
    %c0_i32_0 = arith.constant 0 : i32
    return %arg0, %c0_i32 : i32, i32
  }
  func.func @transform_1(%arg0: i32) -> (i32, i32) {
    %c0_i32 = arith.constant 0 : i32
    %c0_i32_0 = arith.constant 0 : i32
    return %arg0, %c0_i32 : i32, i32
  }
  func.func @transform_2(%arg0: i32) -> (i32, i32) {
    %c0_i32 = arith.constant 0 : i32
    %c0_i32_0 = arith.constant 0 : i32
    return %arg0, %c0_i32 : i32, i32
  }
  func.func @transform_3(%arg0: i32) -> (i32, i32) {
    %c0_i32 = arith.constant 0 : i32
    %c0_i32_0 = arith.constant 0 : i32
    %c0_i32_1 = arith.constant 0 : i32
    return %c0_i32, %c0_i32_0 : i32, i32
  }
  func.func @transform_4(%arg0: i32) -> (i32, i32) {
    %c0_i32 = arith.constant 0 : i32
    %c0_i32_0 = arith.constant 0 : i32
    %c0_i32_1 = arith.constant 0 : i32
    return %c0_i32, %c0_i32_0 : i32, i32
  }
  func.func @transform_5(%arg0: i32) -> (i32, i32) {
    %c0_i32 = arith.constant 0 : i32
    %c0_i32_0 = arith.constant 0 : i32
    %c0_i32_1 = arith.constant 0 : i32
    return %c0_i32, %c0_i32_0 : i32, i32
  }
  func.func @transform_6(%arg0: i32) -> (i32, i32) {
    %c0_i32 = arith.constant 0 : i32
    %c0_i32_0 = arith.constant 0 : i32
    %c0_i32_1 = arith.constant 0 : i32
    return %c0_i32, %c0_i32_0 : i32, i32
  }
  func.func @transform_7(%arg0: i32) -> (i32, i32) {
    %c0_i32 = arith.constant 0 : i32
    %c0_i32_0 = arith.constant 0 : i32
    return %arg0, %c0_i32 : i32, i32
  }
}

</mosaic_0001>

<bundles_post_ra>
// kernel: tpu_custom_call.1
= control target key start
LH: loop header
LB: loop body
LE: loop exit
PB: predicated region body
PF: predicated region fallthrough
CT: control target
= control target key end

     0   :  { %12 = vsyncpa [#allocation3], 0  ;;  %s722_s0 = inlined_call_operand.hbm [shape: f32[8,64], index: 0, kind: input, shape index: {}]   ;;  %s723_s1 = inlined_call_operand.hbm [shape: f32[8,16], index: 1, kind: input, shape index: {}]   ;;  %s724_s2 = inlined_call_operand.hbm [shape: f32[8,16], index: 2, kind: input, shape index: {}]   ;;  %s725_s3 = inlined_call_operand.hbm [shape: f32[64,96], index: 3, kind: input, shape index: {}]   ;;  %s726_s4 = inlined_call_operand.hbm [shape: f32[16,96], index: 4, kind: input, shape index: {}]   ;;  %s727_s5 = inlined_call_operand.vmem [shape: f32[16,96], index: 5, kind: input, shape index: {}]   ;;  %s728_s6 = inlined_call_operand.vmem [shape: f32[1,96], index: 6, kind: input, shape index: {}]   ;;  %s729_s7 = inlined_call_operand.hbm [shape: f32[8,96], index: 7, kind: output, shape index: {}]  }
   0x1   :  { %13 = vsyncpa [#allocation6], 0 }
   0x2   :  { %14 = vsyncpa [#allocation9], 0 }
   0x3   :  { %15 = vsyncpa [#allocation4], 0  ;;  %s574_s24 = smov [#allocation5]   ;;  %s575_s26 = smov [#allocation8]  }
   0x4   :  { %s32_s25 = sshll.u32 %s574_s24, 4  ;;  %s51_s27 = sshll.u32 %s575_s26, 4  ;;  %s33_s25 = int_to_ptr.vmem [resolvable:$true] %s32_s25  ;;  %s625_s27 = int_to_ptr.vmem [resolvable:$true] %s51_s27 }
   0x5   :  { %s434_s30 = scalar_lea.hbm %s723_s1, 128 }
   0x6   :  { %p435_p0 = scmp.ne.s32.totalorder %s723_s1, %s434_s30  ;;  %p438_p1 = scmp.lt.u32.totalorder %s434_s30, %s723_s1 }
   0x8   :  { %p440_p2 = pnand %p438_p1, %p435_p0 }
   0xa   :  { %443 = shalt.err (!%p440_p2)
}
   0xb   :  { %s444_s12 = scalar_lea.vmem %s33_s25, 128  ;;  %p449_p4 = scmp.lt.s32.totalorder %s33_s25, %s33_s25 }
   0xc   :  { %p445_p3 = scmp.ne.s32.totalorder %s33_s25, %s444_s12  ;;  %p450_p5 = scmp.lt.s32.totalorder %s444_s12, %s444_s12 }
   0xe   :  { %p451_p6 = por %p450_p5, %p449_p4 }
  0x10   :  { %p452_p7 = pnand %p451_p6, %p445_p3 }
  0x12   :  { %455 = shalt.err (!%p452_p7)
}
  0x13   :  { %35 = dma.hbm_to_vmem [thread:$0]  %s723_s1, 128, %s33_s25, [#allocation6]  }
  0x14   :  { %s456_s17 = scalar_lea.hbm %s725_s3, 1024 }
  0x15   :  { %p457_p8 = scmp.ne.s32.totalorder %s725_s3, %s456_s17  ;;  %p460_p9 = scmp.lt.u32.totalorder %s456_s17, %s725_s3 }
  0x17   :  { %p462_p10 = pnand %p460_p9, %p457_p8 }
  0x19   :  { %465 = shalt.err (!%p462_p10)
}
  0x1a   :  { %s466_s22 = scalar_lea.vmem %s625_s27, 1024  ;;  %p471_p12 = scmp.lt.s32.totalorder %s625_s27, %s625_s27 }
  0x1b   :  { %p467_p11 = scmp.ne.s32.totalorder %s625_s27, %s466_s22  ;;  %p472_p13 = scmp.lt.s32.totalorder %s466_s22, %s466_s22 }
  0x1d   :  { %p473_p0 = por %p472_p13, %p471_p12 }
  0x1f   :  { %p474_p1 = pnand %p473_p0, %p467_p11 }
  0x21   :  { %477 = shalt.err (!%p474_p1)
}
  0x22   :  { %s576_s1 = smov 128   ;;  %s577_s23 = smov 8  }
  0x23   :  { %57 = dma.hbm_to_vmem [thread:$0]  %s725_s3, 1024, %s625_s27, [#allocation9], %s576_s1, %s576_s1, %s577_s23  }
  0x24   :  { %s578_s26 = smov [#allocation2]   ;;  %s579_s29 = smov [#allocation7]  }
  0x25   :  { %s22_s28 = sshll.u32 %s578_s26, 4  ;;  %s42_s30 = sshll.u32 %s579_s29, 4  ;;  %s23_s28 = int_to_ptr.vmem [resolvable:$true] %s22_s28  ;;  %s43_s30 = int_to_ptr.vmem [resolvable:$true] %s42_s30 }
  0x26   :  { %s478_s10 = scalar_lea.hbm %s722_s0, 128 }
  0x27   :  { %p479_p2 = scmp.ne.s32.totalorder %s722_s0, %s478_s10  ;;  %p482_p3 = scmp.lt.u32.totalorder %s478_s10, %s722_s0 }
  0x29   :  { %p484_p4 = pnand %p482_p3, %p479_p2 }
  0x2b   :  { %487 = shalt.err (!%p484_p4)
}
  0x2c   :  { %s488_s3 = scalar_lea.vmem %s23_s28, 128  ;;  %p493_p6 = scmp.lt.s32.totalorder %s23_s28, %s23_s28 }
  0x2d   :  { %p489_p5 = scmp.ne.s32.totalorder %s23_s28, %s488_s3  ;;  %p494_p7 = scmp.lt.s32.totalorder %s488_s3, %s488_s3 }
  0x2f   :  { %p495_p8 = por %p494_p7, %p493_p6 }
  0x31   :  { %p496_p9 = pnand %p495_p8, %p489_p5 }
  0x33   :  { %499 = shalt.err (!%p496_p9)
}
  0x34   :  { %25 = dma.hbm_to_vmem [thread:$0]  %s722_s0, 128, %s23_s28, [#allocation3]  }
  0x35   :  { %s500_s18 = scalar_lea.hbm %s724_s2, 128 }
  0x36   :  { %p501_p10 = scmp.ne.s32.totalorder %s724_s2, %s500_s18  ;;  %p504_p11 = scmp.lt.u32.totalorder %s500_s18, %s724_s2 }
  0x38   :  { %p506_p12 = pnand %p504_p11, %p501_p10 }
  0x3a   :  { %509 = shalt.err (!%p506_p12)
}
  0x3b   :  { %s510_s24 = scalar_lea.vmem %s43_s30, 128  ;;  %p515_p0 = scmp.lt.s32.totalorder %s43_s30, %s43_s30 }
  0x3c   :  { %p511_p13 = scmp.ne.s32.totalorder %s43_s30, %s510_s24  ;;  %p516_p1 = scmp.lt.s32.totalorder %s510_s24, %s510_s24 }
  0x3e   :  { %p517_p2 = por %p516_p1, %p515_p0 }
  0x40   :  { %p518_p3 = pnand %p517_p2, %p511_p13 }
  0x42   :  { %521 = shalt.err (!%p518_p3)
}
  0x43   :  { %45 = dma.hbm_to_vmem [thread:$0]  %s724_s2, 128, %s43_s30, [#allocation6]  }
  0x44   :  { %s580_s26 = smov [#allocation10]   ;;  %s522_s9 = scalar_lea.hbm %s726_s4, 256 }
  0x45   :  { %s63_s28 = sshll.u32 %s580_s26, 4  ;;  %p523_p4 = scmp.ne.s32.totalorder %s726_s4, %s522_s9  ;;  %s64_s28 = int_to_ptr.vmem [resolvable:$true] %s63_s28 }
  0x46   :  { %p526_p5 = scmp.lt.u32.totalorder %s522_s9, %s726_s4 }
  0x48   :  { %p528_p6 = pnand %p526_p5, %p523_p4 }
  0x4a   :  { %531 = shalt.err (!%p528_p6)
}
  0x4b   :  { %s532_s14 = scalar_lea.vmem %s64_s28, 256  ;;  %p537_p8 = scmp.lt.s32.totalorder %s64_s28, %s64_s28 }
  0x4c   :  { %p533_p7 = scmp.ne.s32.totalorder %s64_s28, %s532_s14  ;;  %p538_p9 = scmp.lt.s32.totalorder %s532_s14, %s532_s14 }
  0x4e   :  { %p539_p10 = por %p538_p9, %p537_p8 }
  0x50   :  { %p540_p11 = pnand %p539_p10, %p533_p7 }
  0x52   :  { %543 = shalt.err (!%p540_p11)
}
  0x53   :  { %69 = dma.hbm_to_vmem [thread:$0]  %s726_s4, 256, %s64_s28, [#allocation9], %s576_s1, %s576_s1, %s577_s23  }
  0x54   :  { %566 = dma.done.wait [#allocation3], 128  }
  0x55   :  { %567 = vsyncadd [#allocation3], 4294967168 }
  0x56   :  { %568 = dma.done.wait [#allocation6], 256  }
  0x57   :  { %569 = vsyncadd [#allocation6], 4294967040 }
  0x58   :  { %570 = dma.done.wait [#allocation9], 1280  }
  0x59   :  { %571 = vsyncadd [#allocation9], 4294966016  ;;  %v581_v0 = vmov 0.0|0.0   ;;  %vm582_vm0 = vmmov 0   ;;  %v583_v1 = vmov 0.0   ;;  %v90_v2 = vld [vmem:[#allocation8] sm:$0xff] }
  0x5a   :  { %408 = vmatprep.subr.bf16.mxu1 %v581_v0  ;;  %405 = vmatprep.subr.bf16.mxu0 %v581_v0  ;;  %v91_v3 = vld [vmem:[#allocation8 + $0x8] sm:$0xff]  ;;  %v92_v4 = vld [vmem:[#allocation8 + $0x10] sm:$0xff]  ;;  %v93_v6 = vld [vmem:[#allocation8 + $0x18] sm:$0xff]  ;;  %vm101_vm1 = vcmask 130048   ;;  %vm175_vm2 = vcmask 523264   ;;  %s584_s15 = smov [#allocation11]  }
  0x5b   :  { %376 = vmatprep.mubr.msk.f32.mxu0 %vm582_vm0, %v583_v1  ;;  %395 = vmatprep.mubr.msk.f32.mxu1 %vm582_vm0, %v583_v1  ;;  %v409_v5 = vpack.c.bf16 %v91_v3, %v90_v2  ;;  %v99_v7 = vld [vmem:[#allocation10] sm:$0xff]  ;;  %v100_v8 = vld [vmem:[#allocation10 + $0x8] sm:$0xff]  ;;  %v412_v9 = vpack.c.bf16 %v93_v6, %v92_v4  ;;  %v250_v11 = vld [vmem:[%s727_s5] sm:$0xff]  ;;  %s342_s16 = sshll.u32 %s584_s15, 4  ;;  %vm334_vm3 = vcmask 785408   ;;  %s343_s16 = int_to_ptr.vmem [resolvable:$true] %s342_s16 }
  0x5c   :  { %v406_v10 = vpack.c.bf16 %v100_v8, %v99_v7  ;;  %v94_v12 = vld [vmem:[#allocation8 + $0x20] sm:$0xff]  ;;  %v95_v13 = vld [vmem:[#allocation8 + $0x28] sm:$0xff]  ;;  %v98_v15 = vld [vmem:[#allocation5] sm:$0xff]  ;;  %s544_s17 = scalar_lea.vmem %s343_s16, 128  ;;  %p549_p13 = scmp.lt.s32.totalorder %s343_s16, %s343_s16 }
  0x5d   :  { %410 = vmatpush3.bf16.msra.mxu1 %v409_v5  ;;  %v251_v14 = vld [vmem:[%s727_s5 + $0x8] sm:$0xff]  ;;  %v415_v17 = vpack.c.bf16 %v95_v13, %v94_v12  ;;  %v96_v18 = vld [vmem:[#allocation8 + $0x30] sm:$0xff]  ;;  %v97_v19 = vld [vmem:[#allocation8 + $0x38] sm:$0xff]  ;;  %p545_p12 = scmp.ne.s32.totalorder %s343_s16, %s544_s17  ;;  %p550_p0 = scmp.lt.s32.totalorder %s544_s17, %s544_s17 }
  0x5e   :  { %411 = vmatprep.subr.bf16.mxu1 %v581_v0  ;;  %407 = vmatpush3.bf16.msra.mxu0 %v406_v10  ;;  %v421_v16 = vpack.c.bf16 %v251_v14, %v250_v11  ;;  %v249_v20 = vld [vmem:[#allocation7] sm:$0xff]  ;;  %v418_v21 = vpack.c.bf16 %v97_v19, %v96_v18  ;;  %v89_v22 = vld [vmem:[#allocation2] sm:$0xff] }
  0x5f   :  { %420 = vmatprep.subr.bf16.mxu0 %v581_v0  ;;  %v356_v30 = vld [vmem:[%s728_s6] ss:$0 sm:$0xff]  ;;  %p551_p1 = por %p550_p0, %p549_p13 }
  0x61   :  { %413 = vmatpush3.bf16.msra.mxu1 %v412_v9  ;;  %377 = vmatmul.mubr.msk.f32.vlgmr.msra.gmra.mrb[0].mxu0 %vm101_vm1, %v98_v15  ;;  %p552_p2 = pnand %p551_p1, %p545_p12 }
  0x62   :  { %414 = vmatprep.subr.bf16.mxu1 %v581_v0  ;;  %422 = vmatpush3.bf16.msra.mxu0 %v421_v16 }
  0x63   :  { %402 = vmatprep.mubr.msk.f32.mxu0 %vm582_vm0, %v583_v1 }
  0x65   :  { %416 = vmatpush3.bf16.msra.mxu1 %v415_v17  ;;  %403 = vmatmul.mubr.msk.f32.vlgmr.msra.gmra.mrb[2].mxu0 %vm101_vm1, %v249_v20 }
  0x66   :  { %417 = vmatprep.subr.bf16.mxu1 %v581_v0 }
  0x69   :  { %419 = vmatpush3.bf16.msra.mxu1 %v418_v21 }
  0x6c   :  { %396 = vmatmul.mubr.msk.f32.vlgmr.msra.gmra.mrb[0].mxu1 %vm175_vm2, %v89_v22 }
 0x134   :  { %v171_v23 = vpop.f32.mrb[0].mxu0 }
 0x135   :  { %v378_v24 = vpop.f32.mrb[1].mxu0 }
 0x138   :  { %v321_v25 = vpop.f32.mrb[2].mxu0 }
 0x139   :  { %v404_v26 = vpop.f32.mrb[3].mxu0 }
 0x13f   :  { %v245_v27 = vpop.f32.mrb[0].mxu1 }
 0x140   :  { %v246_v28 = vadd.f32 %v245_v27, %v171_v23  ;;  %v397_v29 = vpop.f32.mrb[1].mxu1 }
 0x142   :  { %v325_v31 = vadd.f32 %v321_v25, %v246_v28 }
 0x144   :  { %v333_v32 = vadd.f32 %v356_v30, %v325_v31 }
 0x146   :  { %335 = vst.msk [vmem:[#allocation11] sm:$0xff] %vm334_vm3, %v333_v32 }
 0x147   :  { %555 = shalt.err (!%p552_p2)
}
 0x148   :  { %s556_s20 = scalar_lea.hbm %s729_s7, 128 }
 0x149   :  { %p557_p3 = scmp.ne.s32.totalorder %s729_s7, %s556_s20  ;;  %p560_p4 = scmp.lt.u32.totalorder %s556_s20, %s729_s7 }
 0x14b   :  { %p562_p5 = pnand %p560_p4, %p557_p3 }
 0x14d   :  { %565 = shalt.err (!%p562_p5)
}
 0x14e   :  { %345 = dma.vmem_to_hbm [thread:$0]  %s343_s16, 128, %s729_s7, [#allocation4]  }
 0x14f   :  { %572 = dma.done.wait [#allocation4], 128  }
 0x150   :  { %573 = vsyncadd [#allocation4], 4294967168 }
 0x151   :  { %349 = vsyncpa [#allocation3], 1 }
 0x152   :  { %350 = vsyncpa [#allocation6], 1 }
 0x153   :  { %351 = vsyncpa [#allocation9], 1 }
 0x154   :  { %352 = vsyncpa [#allocation4], 1 }

</bundles_post_ra>
